<compile_context>
chip_gen: v6e
topology: v6e:2x2x1
jax: 0.10.0
libtpu: 0.0.40
codegen_flags: <defaults>
</compile_context>

<pallas_src>
import functools

import jax
import jax.numpy as jnp
from jax.experimental import pallas as pl
from jax.experimental.pallas import tpu as pltpu


# ----------------------------------------------------------------------------
# Path A: direct HBM->HBM strided copy, K concurrent DMAs per grid step.
# Used when each output row is long enough for efficient strided bursts.
# ----------------------------------------------------------------------------
def _make_dma_kernel(rows_per_prog: int, l_out: int, num_dmas: int):
    """Build a kernel that copies `rows_per_prog` rows with `num_dmas` DMAs."""
    base = -(-rows_per_prog // num_dmas)  # ceil div
    chunks = []
    off = 0
    while off < rows_per_prog:
        sz = min(base, rows_per_prog - off)
        chunks.append((off, sz))
        off += sz
    k = len(chunks)  # actual number of outstanding DMAs (static)

    def kernel(x_hbm, o_hbm, sems):
        row0 = pl.program_id(0) * rows_per_prog
        copies = []
        for i, (coff, csz) in enumerate(chunks):
            cp = pltpu.make_async_copy(
                x_hbm.at[pl.ds(row0 + coff, csz), pl.ds(0, l_out)],  # skip tail
                o_hbm.at[pl.ds(row0 + coff, csz)],                   # contiguous dst
                sems.at[i],
            )
            cp.start()
            copies.append(cp)
        for cp in copies:  # wait on all outstanding copies
            cp.wait()

    return kernel, k


# ----------------------------------------------------------------------------
# Path B: VMEM-staged copy for short rows.  BlockSpec auto-pipelining streams
# full contiguous row slabs HBM->VMEM (double buffered), the kernel slices off
# the chomped tail, and the contiguous output slab is written back.
# ----------------------------------------------------------------------------
def _chomp_block_kernel(x_ref, o_ref):
    o_ref[...] = x_ref[:, : o_ref.shape[-1]]


# ----------------------------------------------------------------------------
# Wrapper
# ----------------------------------------------------------------------------
@functools.partial(jax.jit, static_argnames=("chomp_size",))
def chomp1d(x: jax.Array, chomp_size: int) -> jax.Array:
    """Equivalent of torch Chomp1d: x[:, :, :-chomp_size] (chomp_size > 0)."""
    assert chomp_size > 0, "chomp_size must be positive"
    n, c, l = x.shape
    l_out = l - chomp_size
    assert l_out > 0, "chomp_size must be smaller than the sequence length"

    rows = n * c
    itemsize = jnp.dtype(x.dtype).itemsize
    x2 = x.reshape(rows, l)  # free reshape: 2D row-strided problem

    cost = pl.CostEstimate(
        flops=0, transcendentals=0, bytes_accessed=2 * rows * l_out * itemsize
    )

    if l_out * itemsize >= 1024:
        # --- Path A: direct HBM->HBM strided DMA, multi-queue, dual-TC ------
        num_cores = 2 if rows % 2 == 0 else 1          # shard rows across v7x TCs
        rows_per_prog = rows // num_cores
        num_dmas = max(1, min(4, rows_per_prog))       # concurrent DMAs per step
        kernel, k = _make_dma_kernel(rows_per_prog, l_out, num_dmas)

        out2 = pl.pallas_call(
            kernel,
            out_shape=jax.ShapeDtypeStruct((rows, l_out), x.dtype),
            grid=(num_cores,),
            in_specs=[pl.BlockSpec(memory_space=pl.ANY)],   # raw HBM, no staging
            out_specs=pl.BlockSpec(memory_space=pl.ANY),
            scratch_shapes=[pltpu.SemaphoreType.DMA((k,))],
            compiler_params=pltpu.CompilerParams(
                dimension_semantics=("parallel",)),
            cost_estimate=cost,
        )(x2)
    else:
        # --- Path B: short rows -> contiguous full-row reads through VMEM ---
        tr = rows if rows <= 512 else 512               # (8,128)-safe row tile
        # Double-buffered slabs: 2*tr*l + 2*tr*l_out elems; with short rows this
        # is well under the 16 MiB v5e scoped-VMEM default (and v7x's 64 MiB).
        out2 = pl.pallas_call(
            _chomp_block_kernel,
            out_shape=jax.ShapeDtypeStruct((rows, l_out), x.dtype),
            grid=(pl.cdiv(rows, tr),),
            in_specs=[pl.BlockSpec((tr, l), lambda i: (i, 0))],
            out_specs=pl.BlockSpec((tr, l_out), lambda i: (i, 0)),
            compiler_params=pltpu.CompilerParams(
                dimension_semantics=("parallel",)),
            cost_estimate=cost,
        )(x2)

    return out2.reshape(n, c, l_out)


if __name__ == "__main__":
    key = jax.random.PRNGKey(0)
    k1, k2 = jax.random.split(key)

    # Small shape (exercises the VMEM-staged short-row path).
    batch, channels, length = 2, 4, 16
    chomp_size = 3
    x = jax.random.normal(k1, (batch, channels, length), dtype=jnp.float32)
    out = jax.block_until_ready(chomp1d(x, chomp_size))
    ref = x[:, :, :-chomp_size]
    assert out.shape == (batch, channels, length - chomp_size), out.shape
    assert out.dtype == x.dtype
    assert jnp.array_equal(out, ref), "Pallas chomp1d mismatch (short-row path)"

    # Longer rows (exercises the direct HBM->HBM multi-DMA path).
    length2 = 512
    x2 = jax.random.normal(k2, (batch, channels, length2), dtype=jnp.float32)
    out2 = jax.block_until_ready(chomp1d(x2, chomp_size))
    ref2 = x2[:, :, :-chomp_size]
    assert out2.shape == (batch, channels, length2 - chomp_size), out2.shape
    assert jnp.array_equal(out2, ref2), "Pallas chomp1d mismatch (DMA path)"

    print("KERNEL_OK")
</pallas_src>

<mosaic_0001>
module attributes {stable_mosaic.version = 11 : i64} {
  func.func @_chomp_block_kernel(%arg0: i32, %arg1: memref<8x16xf32, #tpu.memory_space<vmem>>, %arg2: memref<8x13xf32, #tpu.memory_space<vmem>>) attributes {dimension_semantics = [#tpu.dimension_semantics<parallel>], iteration_bounds = array<i64: 1>, scalar_prefetch = 0 : i64, scratch_operands = 0 : i64, tpu.core_type = #tpu.core_type<tc>, window_params = [{transform_indices = @transform_0, window_bounds = array<i64: 8, 16>}, {transform_indices = @transform_1, window_bounds = array<i64: 8, 13>}]} {
    %c0 = arith.constant 0 : index
    %c0_0 = arith.constant 0 : index
    %0 = vector.load %arg1[%c0, %c0_0] : memref<8x16xf32, #tpu.memory_space<vmem>>, vector<8x13xf32>
    %c0_1 = arith.constant 0 : index
    %c0_2 = arith.constant 0 : index
    %1 = vector.load %arg2[%c0_1, %c0_2] : memref<8x13xf32, #tpu.memory_space<vmem>>, vector<8x13xf32>
    tpu.vector_store %arg2[%c0_1, %c0_2], %0 {strides = array<i32>} : memref<8x13xf32, #tpu.memory_space<vmem>>, vector<8x13xf32>,
    return
  }
  func.func @transform_0(%arg0: i32) -> (i32, i32) {
    %c0_i32 = arith.constant 0 : i32
    %c0_i32_0 = arith.constant 0 : i32
    return %arg0, %c0_i32 : i32, i32
  }
  func.func @transform_1(%arg0: i32) -> (i32, i32) {
    %c0_i32 = arith.constant 0 : i32
    %c0_i32_0 = arith.constant 0 : i32
    return %arg0, %c0_i32 : i32, i32
  }
}

</mosaic_0001>

<bundles_post_ra>
// kernel: chomp1d.1
= control target key start
LH: loop header
LB: loop body
LE: loop exit
PB: predicated region body
PF: predicated region fallthrough
CT: control target
= control target key end

     0   :  { %6 = vsyncpa [#allocation3], 0  ;;  %s103_s0 = inlined_call_operand.hbm [shape: f32[8,16], index: 0, kind: input, shape index: {}]   ;;  %s104_s1 = inlined_call_operand.hbm [shape: f32[8,13], index: 1, kind: output, shape index: {}]  }
   0x1   :  { %7 = vsyncpa [#allocation4], 0  ;;  %s85_s6 = smov [#allocation2]  }
   0x2   :  { %s14_s7 = sshll.u32 %s85_s6, 4  ;;  %s15_s7 = int_to_ptr.vmem [resolvable:$true] %s14_s7 }
   0x3   :  { %s49_s8 = scalar_lea.vmem %s15_s7, 128  ;;  %p54_p1 = scmp.lt.s32.totalorder %s15_s7, %s15_s7 }
   0x4   :  { %p50_p0 = scmp.ne.s32.totalorder %s15_s7, %s49_s8  ;;  %p55_p2 = scmp.lt.s32.totalorder %s49_s8, %s49_s8 }
   0x6   :  { %p56_p3 = por %p55_p2, %p54_p1 }
   0x8   :  { %p57_p4 = pnand %p56_p3, %p50_p0 }
   0xa   :  { %60 = shalt.err (!%p57_p4)
}
   0xb   :  { %17 = dma.hbm_to_vmem [thread:$0]  %s103_s0, 128, %s15_s7, [#allocation3]  }
   0xc   :  { %81 = dma.done.wait [#allocation3], 128  }
   0xd   :  { %82 = vsyncadd [#allocation3], 4294967168  ;;  %s86_s11 = smov [#allocation5]   ;;  %vm22_vm0 = vcmask 105472   ;;  %v21_v0 = vld [vmem:[#allocation2] sm:$0xff] }
   0xe   :  { %s30_s12 = sshll.u32 %s86_s11, 4  ;;  %23 = vst.msk [vmem:[#allocation5] sm:$0xff] %vm22_vm0, %v21_v0  ;;  %s31_s12 = int_to_ptr.vmem [resolvable:$true] %s30_s12 }
   0xf   :  { %s61_s13 = scalar_lea.vmem %s31_s12, 128  ;;  %p66_p6 = scmp.lt.s32.totalorder %s31_s12, %s31_s12 }
  0x10   :  { %p62_p5 = scmp.ne.s32.totalorder %s31_s12, %s61_s13  ;;  %p67_p7 = scmp.lt.s32.totalorder %s61_s13, %s61_s13 }
  0x12   :  { %p68_p8 = por %p67_p7, %p66_p6 }
  0x14   :  { %p69_p9 = pnand %p68_p8, %p62_p5 }
  0x16   :  { %72 = shalt.err (!%p69_p9)
}
  0x17   :  { %33 = dma.vmem_to_hbm [thread:$0]  %s31_s12, 128, %s104_s1, [#allocation4]  }
  0x18   :  { %83 = dma.done.wait [#allocation4], 128  }
  0x19   :  { %84 = vsyncadd [#allocation4], 4294967168 }
  0x1a   :  { %37 = vsyncpa [#allocation3], 1 }
  0x1b   :  { %38 = vsyncpa [#allocation4], 1 }

</bundles_post_ra>
